<compile_context>
chip_gen: v7x
topology: tpu7x:2x2x1
jax: 0.10.0
libtpu: 0.0.40
codegen_flags: <defaults>
</compile_context>

<pallas_src>
import functools

import jax
import jax.numpy as jnp
from jax.experimental import pallas as pl
from jax.experimental.pallas import tpu as pltpu


# ----------------------------- Kernel 1 ------------------------------------
def _softmax_nll_kernel(tgt_ref, pred_ref, prob_ref, nll_ref, *,
                        ignore_label, hw, tile):
    # pred_ref: (c, TILE)  -- class on sublanes, pixel on lanes
    # tgt_ref / prob_ref / nll_ref: (1, TILE)
    x = pred_ref[...].astype(jnp.float32)          # (c, T)
    tgt = tgt_ref[...]                             # (1, T) int32

    # Tail mask for the last (possibly partial) pixel tile.
    start = pl.program_id(1) * tile
    pix = start + jax.lax.broadcasted_iota(jnp.int32, (1, tile), 1)
    in_range = pix < hw                            # (1, T)

    valid = jnp.logical_and(in_range, tgt != ignore_label)
    tgt_c = jnp.where(valid, tgt, 0)               # clamp ignored/padded to 0

    # numerically stable log-softmax over the class (sublane) dim
    m = jnp.max(x, axis=0, keepdims=True)          # (1, T)
    ex = jnp.exp(x - m)
    logz = jnp.log(jnp.sum(ex, axis=0, keepdims=True)) + m   # (1, T)

    # gather logit of the target class via one-hot compare (c is small)
    iota_c = jax.lax.broadcasted_iota(jnp.int32, x.shape, 0)  # (c, T)
    onehot = iota_c == tgt_c                                   # broadcast (1,T)
    x_t = jnp.sum(jnp.where(onehot, x, 0.0), axis=0, keepdims=True)  # (1, T)

    logp_t = x_t - logz                            # (1, T)
    p_t = jnp.exp(logp_t)                          # softmax prob of target class

    # valid -> p_t ; ignored (in range) -> 1.0 (masked_fill_) ; padded tail -> 2.0
    prob_ref[...] = jnp.where(valid, p_t, jnp.where(in_range, 1.0, 2.0))
    nll_ref[...] = jnp.where(in_range, -logp_t, 0.0)   # per-pixel CE (unreduced)


# ----------------------------- Kernel 2 ------------------------------------
def _masked_sum_kernel(nll_ref, mask_ref, sum_ref, cnt_ref, *, hw, tile):
    @pl.when(jnp.logical_and(pl.program_id(0) == 0, pl.program_id(1) == 0))
    def _():
        sum_ref[...] = jnp.zeros_like(sum_ref)
        cnt_ref[...] = jnp.zeros_like(cnt_ref)

    start = pl.program_id(1) * tile
    pix = start + jax.lax.broadcasted_iota(jnp.int32, (1, tile), 1)
    in_range = pix < hw                                        # (1, T)

    nll = nll_ref[...]                                         # (1, T)
    m = mask_ref[...]                                          # (1, T)
    sum_ref[...] += jnp.sum(jnp.where(in_range, nll * m, 0.0), keepdims=True)
    cnt_ref[...] += jnp.sum(jnp.where(in_range, m, 0.0), keepdims=True)


# ----------------------------- Wrapper --------------------------------------
def prob_ohem_cross_entropy_2d(pred, target, *, ignore_label=255,
                               thresh=0.6, min_kept=256, tile_hw=None):
    """pred: (b, c, h, w) float, target: (b, h, w) int labels."""
    b, c, h, w = pred.shape
    hw = h * w
    n = b * hw

    # Pick a large lane-dense pixel tile; tail handled by masking in-kernel.
    if tile_hw is None:
        tile_hw = 4096
    tile_hw = min(tile_hw, hw)
    if tile_hw < hw and tile_hw % 128 != 0:
        tile_hw = max(128, (tile_hw // 128) * 128)
    tile_hw = min(tile_hw, hw)
    n_tiles = pl.cdiv(hw, tile_hw)
    grid = (b, n_tiles)

    # Free reshapes of the native NCHW layout (no transpose, no dtype cast).
    pred3d = pred.reshape(b, c, hw)
    tgt3d = target.reshape(b, 1, hw).astype(jnp.int32)

    vec_spec = pl.BlockSpec((None, 1, tile_hw), lambda ib, it: (ib, 0, it))
    pred_spec = pl.BlockSpec((None, c, tile_hw), lambda ib, it: (ib, 0, it))

    prob_t, nll = pl.pallas_call(
        functools.partial(_softmax_nll_kernel, ignore_label=ignore_label,
                          hw=hw, tile=tile_hw),
        out_shape=(jax.ShapeDtypeStruct((b, 1, hw), jnp.float32),
                   jax.ShapeDtypeStruct((b, 1, hw), jnp.float32)),
        grid_spec=pltpu.PrefetchScalarGridSpec(
            num_scalar_prefetch=0, grid=grid,
            in_specs=[vec_spec, pred_spec],
            out_specs=[vec_spec, vec_spec]),
        compiler_params=pltpu.CompilerParams(
            dimension_semantics=("parallel", "parallel")),
    )(tgt3d, pred3d)

    prob_flat = prob_t.reshape(n)
    tgt_flat = target.reshape(n).astype(jnp.int32)
    valid = tgt_flat != ignore_label
    num_valid = jnp.sum(valid.astype(jnp.int32))

    if min_kept > 0:
        # k-th smallest target-class probability via top_k of negated probs
        # (avoids an O(n log n) full sort for large n).
        k = min(n, min_kept)
        kth = -jax.lax.top_k(-prob_flat, k)[0][k - 1]
        threshold = jnp.maximum(kth, jnp.float32(thresh))
        kept = prob_flat <= threshold
        ohem_active = num_valid >= jnp.int32(min_kept)
        final_valid = jnp.where(ohem_active,
                                jnp.logical_and(valid, kept), valid)
    else:
        final_valid = valid

    mask3d = final_valid.astype(jnp.float32).reshape(b, 1, hw)

    loss_sum, cnt = pl.pallas_call(
        functools.partial(_masked_sum_kernel, hw=hw, tile=tile_hw),
        out_shape=(jax.ShapeDtypeStruct((1, 1), jnp.float32),
                   jax.ShapeDtypeStruct((1, 1), jnp.float32)),
        grid_spec=pltpu.PrefetchScalarGridSpec(
            num_scalar_prefetch=0, grid=grid,
            in_specs=[vec_spec, vec_spec],
            out_specs=[pl.BlockSpec((1, 1), lambda ib, it: (0, 0)),
                       pl.BlockSpec((1, 1), lambda ib, it: (0, 0))]),
        compiler_params=pltpu.CompilerParams(
            dimension_semantics=("arbitrary", "arbitrary")),
    )(nll, mask3d)

    # CrossEntropyLoss(reduction='mean', ignore_index=...): sum / kept count.
    # (Like PyTorch, this yields NaN if every pixel ends up ignored.)
    return (loss_sum / cnt)[0, 0]


# ----------------------------- Reference ------------------------------------
def _reference(pred, target, *, ignore_label, thresh, min_kept):
    b, c, h, w = pred.shape
    n = b * h * w
    tgt = target.reshape(n).astype(jnp.int32)
    valid = tgt != ignore_label
    tgt_c = jnp.where(valid, tgt, 0)
    num_valid = jnp.sum(valid.astype(jnp.int32))
    logits = jnp.transpose(pred, (0, 2, 3, 1)).reshape(n, c).astype(jnp.float32)
    logp = jax.nn.log_softmax(logits, axis=1)
    p_t = jnp.where(valid, jnp.exp(logp[jnp.arange(n), tgt_c]), 1.0)
    if min_kept > 0:
        kth = jnp.sort(p_t)[min(n, min_kept) - 1]
        threshold = jnp.maximum(kth, jnp.float32(thresh))
        kept = p_t <= threshold
        ohem = num_valid >= jnp.int32(min_kept)
        fv = jnp.where(ohem, jnp.logical_and(valid, kept), valid)
    else:
        fv = valid
    fv = fv.astype(jnp.float32)
    nll = -(logp[jnp.arange(n), tgt_c])
    return jnp.sum(nll * fv) / jnp.sum(fv)


if __name__ == "__main__":
    # Small deterministic example: b=2, c=19 classes, h=w=16 -> N = 512 pixels.
    IGNORE = 255
    THRESH = 0.6
    MIN_KEPT = 256

    key = jax.random.PRNGKey(0)
    k_pred, k_tgt, k_ign = jax.random.split(key, 3)

    b, c, h, w = 2, 19, 16, 16
    pred = jax.random.normal(k_pred, (b, c, h, w), dtype=jnp.float32)
    target = jax.random.randint(k_tgt, (b, h, w), 0, c, dtype=jnp.int32)
    # mark ~10% of pixels as ignore_label
    ign_mask = jax.random.uniform(k_ign, (b, h, w)) < 0.1
    target = jnp.where(ign_mask, jnp.int32(IGNORE), target)

    loss = prob_ohem_cross_entropy_2d(
        pred, target, ignore_label=IGNORE, thresh=THRESH, min_kept=MIN_KEPT)
    loss = jax.block_until_ready(loss)

    ref = _reference(pred, target, ignore_label=IGNORE, thresh=THRESH,
                     min_kept=MIN_KEPT)
    ref = jax.block_until_ready(ref)

    assert jnp.isfinite(loss), "loss is not finite"
    assert jnp.allclose(loss, ref, rtol=1e-4, atol=1e-5), (loss, ref)
    print("KERNEL_OK")
</pallas_src>

<mosaic_0001>
module attributes {stable_mosaic.version = 11 : i64} {
  func.func @_softmax_nll_kernel(%arg0: i32, %arg1: i32, %arg2: memref<1x1x256xi32, #tpu.memory_space<vmem>>, %arg3: memref<1x19x256xf32, #tpu.memory_space<vmem>>, %arg4: memref<1x1x256xf32, #tpu.memory_space<vmem>>, %arg5: memref<1x1x256xf32, #tpu.memory_space<vmem>>) attributes {dimension_semantics = [#tpu.dimension_semantics<parallel>, #tpu.dimension_semantics<parallel>], iteration_bounds = array<i64: 2, 1>, scalar_prefetch = 0 : i64, scratch_operands = 0 : i64, tpu.core_type = #tpu.core_type<tc>, window_params = [{transform_indices = @transform_0, window_bounds = array<i64: 1, 1, 256>}, {transform_indices = @transform_1, window_bounds = array<i64: 1, 19, 256>}, {transform_indices = @transform_2, window_bounds = array<i64: 1, 1, 256>}, {transform_indices = @transform_3, window_bounds = array<i64: 1, 1, 256>}]} {
    %c0 = arith.constant 0 : index
    %c0_0 = arith.constant 0 : index
    %c0_1 = arith.constant 0 : index
    %0 = vector.load %arg3[%c0, %c0_0, %c0_1] : memref<1x19x256xf32, #tpu.memory_space<vmem>>, vector<1x19x256xf32>
    %1 = vector.shape_cast %0 : vector<1x19x256xf32> to vector<19x256xf32>
    %c0_2 = arith.constant 0 : index
    %c0_3 = arith.constant 0 : index
    %c0_4 = arith.constant 0 : index
    %2 = vector.load %arg2[%c0_2, %c0_3, %c0_4] : memref<1x1x256xi32, #tpu.memory_space<vmem>>, vector<1x1x256xi32>
    %3 = vector.shape_cast %2 : vector<1x1x256xi32> to vector<1x256xi32>
    %c256_i32 = arith.constant 256 : i32
    %4 = arith.muli %arg1, %c256_i32 : i32
    %5 = tpu.iota {dimensions = array<i32: 1>} : vector<1x256xi32>
    %6 = vector.broadcast %4 : i32 to vector<1x256xi32>
    %7 = arith.addi %6, %5 : vector<1x256xi32>
    %c256_i32_5 = arith.constant 256 : i32
    %8 = vector.broadcast %c256_i32_5 : i32 to vector<1x256xi32>
    %9 = arith.cmpi slt, %7, %8 : vector<1x256xi32>
    %c255_i32 = arith.constant 255 : i32
    %10 = vector.broadcast %c255_i32 : i32 to vector<1x256xi32>
    %11 = arith.cmpi ne, %3, %10 : vector<1x256xi32>
    %12 = arith.andi %9, %11 : vector<1x256xi1>
    %c0_i32 = arith.constant 0 : i32
    %13 = vector.broadcast %c0_i32 : i32 to vector<1x256xi32>
    %14 = arith.select %12, %3, %13 : vector<1x256xi1>, vector<1x256xi32>
    %cst = arith.constant dense<0xFF800000> : vector<256xf32>
    %15 = vector.multi_reduction <maximumf>, %1, %cst [0] : vector<19x256xf32> to vector<256xf32>
    %16 = vector.shape_cast %15 : vector<256xf32> to vector<1x256xf32>
    %17 = vector.broadcast %16 : vector<1x256xf32> to vector<19x256xf32>
    %18 = arith.subf %1, %17 : vector<19x256xf32>
    %19 = math.exp %18 : vector<19x256xf32>
    %cst_6 = arith.constant dense<0.000000e+00> : vector<256xf32>
    %20 = vector.multi_reduction <add>, %19, %cst_6 [0] : vector<19x256xf32> to vector<256xf32>
    %21 = vector.shape_cast %20 : vector<256xf32> to vector<1x256xf32>
    %22 = math.log %21 : vector<1x256xf32>
    %23 = arith.addf %22, %16 : vector<1x256xf32>
    %24 = tpu.iota {dimensions = array<i32: 0>} : vector<19x256xi32>
    %25 = vector.broadcast %14 : vector<1x256xi32> to vector<19x256xi32>
    %26 = arith.cmpi eq, %24, %25 : vector<19x256xi32>
    %cst_7 = arith.constant 0.000000e+00 : f32
    %27 = vector.broadcast %cst_7 : f32 to vector<19x256xf32>
    %28 = arith.select %26, %1, %27 : vector<19x256xi1>, vector<19x256xf32>
    %cst_8 = arith.constant dense<0.000000e+00> : vector<256xf32>
    %29 = vector.multi_reduction <add>, %28, %cst_8 [0] : vector<19x256xf32> to vector<256xf32>
    %30 = vector.shape_cast %29 : vector<256xf32> to vector<1x256xf32>
    %31 = arith.subf %30, %23 : vector<1x256xf32>
    %32 = math.exp %31 : vector<1x256xf32>
    %cst_9 = arith.constant 1.000000e+00 : f32
    %cst_10 = arith.constant 2.000000e+00 : f32
    %33 = vector.broadcast %cst_9 : f32 to vector<1x256xf32>
    %34 = vector.broadcast %cst_10 : f32 to vector<1x256xf32>
    %35 = arith.select %9, %33, %34 : vector<1x256xi1>, vector<1x256xf32>
    %36 = arith.select %12, %32, %35 : vector<1x256xi1>, vector<1x256xf32>
    %c0_11 = arith.constant 0 : index
    %c0_12 = arith.constant 0 : index
    %c0_13 = arith.constant 0 : index
    %37 = vector.load %arg4[%c0_11, %c0_12, %c0_13] : memref<1x1x256xf32, #tpu.memory_space<vmem>>, vector<1x1x256xf32>
    %38 = vector.shape_cast %37 : vector<1x1x256xf32> to vector<1x256xf32>
    %39 = vector.shape_cast %36 : vector<1x256xf32> to vector<1x1x256xf32>
    tpu.vector_store %arg4[%c0_11, %c0_12, %c0_13], %39 {strides = array<i32>} : memref<1x1x256xf32, #tpu.memory_space<vmem>>, vector<1x1x256xf32>,
    %cst_14 = arith.constant 0.000000e+00 : f32
    %40 = vector.broadcast %cst_14 : f32 to vector<1x256xf32>
    %41 = arith.subf %40, %31 : vector<1x256xf32>
    %cst_15 = arith.constant 0.000000e+00 : f32
    %42 = vector.broadcast %cst_15 : f32 to vector<1x256xf32>
    %43 = arith.select %9, %41, %42 : vector<1x256xi1>, vector<1x256xf32>
    %c0_16 = arith.constant 0 : index
    %c0_17 = arith.constant 0 : index
    %c0_18 = arith.constant 0 : index
    %44 = vector.load %arg5[%c0_16, %c0_17, %c0_18] : memref<1x1x256xf32, #tpu.memory_space<vmem>>, vector<1x1x256xf32>
    %45 = vector.shape_cast %44 : vector<1x1x256xf32> to vector<1x256xf32>
    %46 = vector.shape_cast %43 : vector<1x256xf32> to vector<1x1x256xf32>
    tpu.vector_store %arg5[%c0_16, %c0_17, %c0_18], %46 {strides = array<i32>} : memref<1x1x256xf32, #tpu.memory_space<vmem>>, vector<1x1x256xf32>,
    return
  }
  func.func @transform_0(%arg0: i32, %arg1: i32) -> (i32, i32, i32) {
    %c0_i32 = arith.constant 0 : i32
    %c0_i32_0 = arith.constant 0 : i32
    return %arg0, %c0_i32, %arg1 : i32, i32, i32
  }
  func.func @transform_1(%arg0: i32, %arg1: i32) -> (i32, i32, i32) {
    %c0_i32 = arith.constant 0 : i32
    %c0_i32_0 = arith.constant 0 : i32
    return %arg0, %c0_i32, %arg1 : i32, i32, i32
  }
  func.func @transform_2(%arg0: i32, %arg1: i32) -> (i32, i32, i32) {
    %c0_i32 = arith.constant 0 : i32
    %c0_i32_0 = arith.constant 0 : i32
    return %arg0, %c0_i32, %arg1 : i32, i32, i32
  }
  func.func @transform_3(%arg0: i32, %arg1: i32) -> (i32, i32, i32) {
    %c0_i32 = arith.constant 0 : i32
    %c0_i32_0 = arith.constant 0 : i32
    return %arg0, %c0_i32, %arg1 : i32, i32, i32
  }
}

</mosaic_0001>

<bundles_post_ra>
// kernel: tpu_custom_call.1
= control target key start
LH: loop header
LB: loop body
LE: loop exit
PB: predicated region body
PF: predicated region fallthrough
CT: control target
= control target key end

     0   :  { %9 = vsyncpa [#allocation3], 0  ;;  %s1086_s0 = inlined_call_operand.vmem [shape: s32[2,1,256], index: 0, kind: input, shape index: {}]   ;;  %s1087_s1 = inlined_call_operand.vmem [shape: f32[2,19,256], index: 1, kind: input, shape index: {}]   ;;  %s1088_s2 = inlined_call_operand.hbm [shape: f32[2,1,256], index: 2, kind: output, shape index: {0}]   ;;  %s1089_s3 = inlined_call_operand.hbm [shape: f32[2,1,256], index: 3, kind: output, shape index: {1}]  }
   0x1   :  { %11 = vsyncpa [#allocation3 + $0x1], 0 }
   0x2   :  { %12 = vsyncpa [#allocation5], 0 }
   0x3   :  { %14 = vsyncpa [#allocation5 + $0x1], 0  ;;  %s848_s12 = smov 0   ;;  %s850_s13 = smov 0  }
   0x4   :  { %s852_s14 = smov 0   ;;  %s854_s15 = smov 0  }
   0x5   :  { %s856_s16 = smov 0   ;;  %s858_s17 = smov 0  }
   0x6 LB: > { %s610_s18 = sadd.s32 4294967295, %s822_s17   ;;  %s611_s19 = sadd.s32 4294967294, %s822_s17   ;;  %s822_s17 = sphi %s858_s17, %s20_s17   ;;  %s818_s16 = sphi %s856_s16, %s1100_s16   ;;  %s814_s15 = sphi %s854_s15, %s1099_s15   ;;  %s810_s14 = sphi %s852_s14, %s1098_s14   ;;  %s806_s13 = sphi %s850_s13, %s1097_s13   ;;  %s802_s12 = sphi %s848_s12, %s1096_s12  }
   0x7   : > { %s32_s20 = sadd.s32 1, %s818_s16  ;;  %s97_s21 = sadd.s32 1, %s810_s14 }
   0x8   : > { %p34_p0 = scmp.ge.s32.totalorder %s32_s20, 2  ;;  %p107_p1 = scmp.ne.s32.totalorder %s810_s14, %s806_s13 }
   0x9   : > { %p108_p2 = scmp.eq.s32.totalorder %s610_s18, 1  ;;  %p113_p3 = scmp.ne.s32.totalorder %s806_s13, %s802_s12 }
   0xa   : > { %s1102_s20 = smov (%p34_p0, %s32_s20), 0  ;;  %p114_p5 = scmp.eq.s32.totalorder %s611_s19, 1 }
   0xb   : > { %p888_p4 = por %p108_p2, %p107_p1  ;;  %s92_s23 = ssub.s32 %s818_s16, %s1102_s20 }
   0xc   : > { %p614_p6 = scmp.ge.s32.totalorder %s822_s17, 1  ;;  %p95_p7 = scmp.eq.s32.totalorder %s92_s23, 0 }
   0xd   : > { %p895_p8 = por %p114_p5, %p113_p3  ;;  %p185_p9 = scmp.lt.s32.totalorder %s822_s17, 3 }
   0xe   : > { %s901_s25 = scalar_select %p95_p7, %s810_s14, %s97_s21  }
   0xf   : > { %p186_p10 = pnand %p614_p6, %p185_p9 }
  0x10   : > { %p227_p11 = scmp.lt.s32.totalorder (!%p186_p10), %s814_s15, 1  ;;  %vm287_vm0 = vcmask (!%p186_p10), 1042432   ;;  %v265_v10 = vlaneseq (!%p186_p10)  ;;  %v824_v23 = vmov (!%p186_p10), 0   ;;  %s978_s8 = sand.u32 (!%p186_p10), 1, %s806_s13  }
  0x11   : > { %189 = sbr.rel (%p186_p10) target bundleno = 146 (0x92), region = 28  ;;  %s615_s9 = sshll.u32 (!%p186_p10), %s978_s8, 1 }
  0x12   : > { %v932_v16 = vshrl.u32 (!%p186_p10), %v265_v10, 7  ;;  %s225_s10 = scalar_lea.vmem (!%p186_p10), [#allocation4], %s615_s9  ;;  %s627_s18 = sshll.u32 (!%p186_p10), %s814_s15, 5  ;;  %vm988_vm10 = vcmp.lt.s32.totalorder (!%p186_p10), %v265_v10, 256 }
  0x13   : > { %s484_s11 = sshll.u32 (!%p186_p10), %s225_s10, 4  ;;  %s999_s23 = scalar_lea.hbm (!%p186_p10), %s1089_s3, %s627_s18  ;;  %s992_s11 = int_to_ptr.vmem [resolvable:$true] %s484_s11 }
  0x14   : > { %v267_v21 = vsub.s32 (!%p186_p10), 0, %v932_v16  ;;  %v271_v22 = vsub.s32 (!%p186_p10), 1, %v932_v16  ;;  %v350_v50 = vadd.s32 (!%p186_p10), 8, %v932_v16  ;;  %v351_v52 = vadd.s32 (!%p186_p10), 16, %v932_v16  ;;  %s826_s28 = smov (!%p186_p10), [#allocation4]  }
  0x15   : > { %s716_s29 = sshll.u32 (!%p186_p10), %s826_s28, 4  ;;  %s717_s29 = int_to_ptr.vmem [resolvable:$false] %s716_s29 }
  0x16   : > { %p719_p1 = scmp.lt.s32.totalorder (!%p186_p10), %s992_s11, %s717_s29 }
  0x18   : > { %s228_s26 = scalar_select %p227_p11, %s814_s15, 1 }
  0x1a   : > { %s629_s27 = smul.u32 48, %s228_s26  ;;  %s617_s4 = sshll.u32 %s228_s26, 1 }
  0x1b   : > { %s233_s7 = scalar_lea.vmem %s1086_s0, %s617_s4  ;;  %s452_s26 = scalar_lea.sflag [#allocation5], %s978_s8 }
  0x1c   : > { %s243_s30 = scalar_lea.vmem %s1087_s1, %s629_s27  ;;  %v253_v13 = vld [vmem:[%s233_s7] sm:$0x3]  ;;  %s712_s27 = scalar_lea.vmem %s992_s11, 32 }
  0x1d   : > { %v908_v0 = vld [vmem:[%s243_s30] sm:$0xff]  ;;  %v910_v1 = vld [vmem:[%s243_s30 + $0x8] sm:$0xff]  ;;  %v916_v4 = vld [vmem:[%s243_s30 + $0x10] sm:$0xff]  ;;  %vm263_vm1 = vcmp.ne.s32.totalorder %v253_v13, 255  ;;  %v280_v33 = vrot.slane %v253_v13, %v267_v21  ;;  %v284_v34 = vrot.slane %v253_v13, %v271_v22  ;;  %p713_p12 = scmp.ne.s32.totalorder %s992_s11, %s712_s27 }
  0x1e   : > { %v912_v2 = vld [vmem:[%s243_s30 + $0x20] sm:$0x7]  ;;  %v914_v3 = vld [vmem:[%s243_s30 + $0x28] sm:$0x7]  ;;  %v918_v5 = vld [vmem:[%s243_s30 + $0x18] sm:$0xff]  ;;  %v264_v24 = vsel %vm263_vm1, 1, %v824_v23 }
  0x1f   : > { %v288_v6 = vsel %vm287_vm0, %v912_v2, -inf  ;;  %v297_v7 = vsel %vm287_vm0, %v914_v3, -inf  ;;  %v268_v29 = vrot.slane %v264_v24, %v267_v21  ;;  %v936_v30 = vrot.slane %v264_v24, %v271_v22  ;;  %p714_p13 = pnand %p713_p12, %p888_p4  ;;  %s718_s30 = scalar_lea.vmem %s717_s29, 64 }
  0x20   : > { %v289_v8 = vmax.f32 %v908_v0, %v288_v6  ;;  %v298_v9 = vmax.f32 %v910_v1, %v297_v7  ;;  %p720_p2 = scmp.lt.s32.totalorder %s718_s30, %s712_s27 }
  0x21   : > { %vm950_vm2 = vcmp.ne.s32.totalorder %v268_v29, 0  ;;  %vm274_vm3 = vcmp.ne.s32.totalorder %v936_v30, 0  ;;  %p715_p0 = pneg %p714_p13 }
  0x22   : > { %v290_v11 = vmax.f32 %v289_v8, %v916_v4  ;;  %v299_v12 = vmax.f32 %v298_v9, %v918_v5  ;;  %v285_v46 = vsel %vm950_vm2, %v280_v33, 0  ;;  %v286_v48 = vsel %vm274_vm3, %v284_v34, 0  ;;  %p721_p3 = por %p720_p2, %p719_p1 }
  0x23   : > { %v355_v51 = vrot.slane %v285_v46, %v267_v21  ;;  %v359_v53 = vrot.slane %v286_v48, %v267_v21 }
  0x24   : > { %v291_v14 = vrot.slane %v290_v11, 4  ;;  %v300_v15 = vrot.slane %v299_v12, 4  ;;  %p722_p5 = pnand %p721_p3, %p715_p0 }
  0x25   : > { %vm360_vm4 = vcmp.eq.s32.totalorder %v932_v16, %v355_v51  ;;  %vm362_vm5 = vcmp.eq.s32.totalorder %v350_v50, %v355_v51  ;;  %vm361_vm6 = vcmp.eq.s32.totalorder %v932_v16, %v359_v53  ;;  %vm363_vm7 = vcmp.eq.s32.totalorder %v350_v50, %v359_v53 }
  0x26   : > { %v292_v17 = vmax.f32 %v290_v11, %v291_v14  ;;  %v301_v18 = vmax.f32 %v299_v12, %v300_v15  ;;  %vm364_vm8 = vcmp.eq.s32.totalorder %v351_v52, %v355_v51  ;;  %vm365_vm9 = vcmp.eq.s32.totalorder %v351_v52, %v359_v53 }
  0x27   : > { %v366_v55 = vsel %vm360_vm4, %v908_v0, 0.0  ;;  %v368_v56 = vsel %vm362_vm5, %v916_v4, 0.0  ;;  %v367_v58 = vsel %vm361_vm6, %v910_v1, 0.0  ;;  %v369_v59 = vsel %vm363_vm7, %v918_v5, 0.0 }
  0x28   : > { %v293_v19 = vrot.slane %v292_v17, 2  ;;  %v302_v20 = vrot.slane %v301_v18, 2  ;;  %v370_v60 = vsel %vm364_vm8, %v912_v2, 0.0  ;;  %v371_v62 = vsel %vm365_vm9, %v914_v3, 0.0 }
  0x29   : > { %v372_v7 = vadd.f32 %v368_v56, %v366_v55  ;;  %v373_v11 = vsel %vm287_vm0, %v370_v60, 0.0 }
  0x2a   : > { %v294_v25 = vmax.f32 %v292_v17, %v293_v19  ;;  %v303_v26 = vmax.f32 %v301_v18, %v302_v20 }
  0x2b   : > { %v374_v14 = vadd.f32 %v373_v11, %v372_v7 }
  0x2c   : > { %v295_v27 = vrot.slane %v294_v25, 1  ;;  %v304_v28 = vrot.slane %v303_v26, 1 }
  0x2d   : > { %v375_v20 = vrot.slane %v374_v14, 4 }
  0x2e   : > { %v938_v31 = vmax.f32 %v294_v25, %v295_v27  ;;  %v940_v32 = vmax.f32 %v303_v26, %v304_v28 }
  0x2f   : > { %v376_v26 = vadd.f32 %v375_v20, %v374_v14 }
  0x30   : > { %v306_v35 = vsub.f32 %v908_v0, %v938_v31  ;;  %v307_v36 = vsub.f32 %v910_v1, %v940_v32  ;;  %v308_v37 = vsub.f32 %v916_v4, %v938_v31  ;;  %v309_v38 = vsub.f32 %v918_v5, %v940_v32 }
  0x31   : > { %v310_v40 = vsub.f32 %v912_v2, %v938_v31  ;;  %v311_v41 = vsub.f32 %v914_v3, %v940_v32  ;;  %v381_v0 = vadd.f32 %v369_v59, %v367_v58  ;;  %v382_v1 = vsel %vm287_vm0, %v371_v62, 0.0 }
  0x32   : > { %v312_v42 = vmul.f32 1.442695, %v306_v35  ;;  %v314_v43 = vmul.f32 1.442695, %v307_v36  ;;  %v316_v44 = vmul.f32 1.442695, %v308_v37 }
  0x33   : > { %v318_v45 = vmul.f32 1.442695, %v309_v38  ;;  %v320_v47 = vmul.f32 1.442695, %v310_v40  ;;  %v322_v49 = vmul.f32 1.442695, %v311_v41  ;;  %v383_v3 = vadd.f32 %v382_v1, %v381_v0 }
  0x34   : > { %692 = vpow2.f32 %v312_v42  ;;  %v377_v35 = vrot.slane %v376_v26, 2 }
  0x35   : > { %694 = vpow2.f32 %v314_v43  ;;  %v384_v22 = vrot.slane %v383_v3, 4  ;;  %v825_v43 = vmov 1966171168  }
  0x36   : > { %696 = vpow2.f32 %v316_v44  ;;  %v378_v37 = vadd.f32 %v377_v35, %v376_v26  ;;  %v404_v44 = vunpack.c.l.s4 %v825_v43 }
  0x37   : > { %698 = vpow2.f32 %v318_v45  ;;  %v385_v28 = vadd.f32 %v384_v22, %v383_v3 }
  0x38   : > { %700 = vpow2.f32 %v320_v47  ;;  %v379_v40 = vrot.slane %v378_v37, 1  ;;  %v405_v52 = vunpack.c.0.s8 %v404_v44 }
  0x39   : > { %702 = vpow2.f32 %v322_v49  ;;  %v386_v36 = vrot.slane %v385_v28, 2 }
  0x3a   : > { %v380_v47 = vadd.f32 %v379_v40, %v378_v37  ;;  %v408_v58 = vsub.s32 %v405_v52, %v932_v16 }
  0x3b   : > { %v387_v38 = vadd.f32 %v386_v36, %v385_v28 }
  0x3d   : > { %v388_v41 = vrot.slane %v387_v38, 1 }
  0x3e   : > { %v693_v54 = vpop.eup %692 }
  0x3f   : > { %v695_v57 = vpop.eup %694  ;;  %v389_v49 = vadd.f32 %v388_v41, %v387_v38 }
  0x40   : > { %v697_v61 = vpop.eup %696 }
  0x41   : > { %v699_v63 = vpop.eup %698  ;;  %v324_v6 = vadd.f32 %v697_v61, %v693_v54 }
  0x42   : > { %v701_v8 = vpop.eup %700  ;;  %v333_v9 = vadd.f32 %v699_v63, %v695_v57 }
  0x43   : > { %v703_v12 = vpop.eup %702  ;;  %v325_v4 = vsel %vm287_vm0, %v701_v8, 0.0 }
  0x44   : > { %v326_v13 = vadd.f32 %v325_v4, %v324_v6  ;;  %v334_v5 = vsel %vm287_vm0, %v703_v12, 0.0 }
  0x45   : > { %v335_v2 = vadd.f32 %v334_v5, %v333_v9 }
  0x46   : > { %v327_v15 = vrot.slane %v326_v13, 4 }
  0x47   : > { %v336_v17 = vrot.slane %v335_v2, 4 }
  0x48   : > { %v328_v18 = vadd.f32 %v327_v15, %v326_v13 }
  0x49   : > { %v337_v19 = vadd.f32 %v336_v17, %v335_v2 }
  0x4a   : > { %v329_v21 = vrot.slane %v328_v18, 2 }
  0x4b   : > { %v338_v23 = vrot.slane %v337_v19, 2 }
  0x4c   : > { %v330_v24 = vadd.f32 %v329_v21, %v328_v18 }
  0x4d   : > { %v339_v25 = vadd.f32 %v338_v23, %v337_v19 }
  0x4e   : > { %v331_v27 = vrot.slane %v330_v24, 1 }
  0x4f   : > { %v340_v29 = vrot.slane %v339_v25, 1 }
  0x50   : > { %v332_v33 = vadd.f32 %v331_v27, %v330_v24 }
  0x51   : > { %v341_v34 = vadd.f32 %v340_v29, %v339_v25 }
  0x52   : > { %704 = vlog2.f32 %v332_v33 }
  0x53   : > { %706 = vlog2.f32 %v341_v34 }
  0x5c   : > { %v705_v42 = vpop.eup %704 }
  0x5d   : > { %v707_v45 = vpop.eup %706  ;;  %v343_v46 = vmul.f32 0.6931472, %v705_v42 }
  0x5e   : > { %v345_v48 = vmul.f32 0.6931472, %v707_v45 }
  0x5f   : > { %v346_v50 = vadd.f32 %v343_v46, %v938_v31 }
  0x60   : > { %v347_v51 = vadd.f32 %v345_v48, %v940_v32 }
  0x61   : > { %v390_v53 = vsub.f32 %v380_v47, %v346_v50 }
  0x62   : > { %v391_v54 = vsub.f32 %v389_v49, %v347_v51 }
  0x63   : > { %v392_v55 = vmul.f32 1.442695, %v390_v53  ;;  %v423_v56 = vsub.f32 0.0, %v390_v53 }
  0x64   : > { %v394_v57 = vmul.f32 1.442695, %v391_v54  ;;  %v424_v59 = vsub.f32 0.0, %v391_v54 }
  0x65   : > { %708 = vpow2.f32 %v392_v55 }
  0x66   : > { %710 = vpow2.f32 %v394_v57  ;;  %v429_v60 = vcombine.low %v423_v56, %v424_v59 }
  0x68   : > { %v436_v31 = vrot.slane %v429_v60, %v408_v58 }
  0x6a   : > { %v443_v16 = vrot.slane %v436_v31, %v408_v58 }
  0x6c   : > { %445 = vst.msk [vmem:[%s225_s10] sm:$0x3] %vm988_vm10, %v443_v16 }
  0x6d   : > { %725 = shalt.err (!%p722_p5)
}
  0x6e   : > { %s726_s4 = scalar_lea.hbm %s999_s23, 32  ;;  %s730_s7 = scalar_lea.hbm %s1089_s3, 64 }
  0x6f   : > { %p727_p6 = scmp.ne.s32.totalorder %s999_s23, %s726_s4  ;;  %p731_p10 = scmp.lt.u32.totalorder %s999_s23, %s1089_s3 }
  0x70   : > { %p732_p11 = scmp.lt.u32.totalorder %s730_s7, %s726_s4  ;;  %p734_p13 = scmp.lt.u32.totalorder %s726_s4, %s999_s23 }
  0x71   : > { %p728_p7 = pnand %p727_p6, %p888_p4 }
  0x72   : > { %p733_p12 = por %p732_p11, %p731_p10 }
  0x73   : > { %p729_p9 = pneg %p728_p7 }
  0x74   : > { %p735_p0 = por %p734_p13, %p733_p12 }
  0x76   : > { %p736_p1 = pnand %p735_p0, %p729_p9 }
  0x78   : > { %739 = shalt.err (!%p736_p1)
}
  0x79   : > { %631 = dma.vmem_to_hbm [thread:$0]  (%p888_p4), %s992_s11, 32, %s999_s23, %s452_s26   ;;  %v709_v10 = vpop.eup %708 }
  0x7a   : > { %v711_v61 = vpop.eup %710  ;;  %v398_v62 = vsel %vm950_vm2, %v709_v10, 1.0  ;;  %s218_s21 = scalar_lea.vmem [#allocation2], %s615_s9  ;;  %s1038_s23 = scalar_lea.hbm %s1088_s2, %s627_s18 }
  0x7b   : > { %v399_v63 = vsel %vm274_vm3, %v711_v61, 1.0  ;;  %s468_s27 = sshll.u32 %s218_s21, 4  ;;  %s447_s26 = scalar_lea.sflag [#allocation3], %s978_s8  ;;  %s1031_s27 = int_to_ptr.vmem [resolvable:$true] %s468_s27 }
  0x7c   : > { %v402_v6 = vcombine.low %v398_v62, %v399_v63  ;;  %s740_s29 = scalar_lea.vmem %s1031_s27, 32  ;;  %s827_s9 = smov [#allocation2]  }
  0x7d   : > { %p741_p2 = scmp.ne.s32.totalorder %s1031_s27, %s740_s29  ;;  %s744_s30 = sshll.u32 %s827_s9, 4  ;;  %s745_s30 = int_to_ptr.vmem [resolvable:$false] %s744_s30 }
  0x7e   : > { %v409_v7 = vrot.slane %v402_v6, %v408_v58  ;;  %s746_s15 = scalar_lea.vmem %s745_s30, 64  ;;  %p747_p6 = scmp.lt.s32.totalorder %s1031_s27, %s745_s30 }
  0x7f   : > { %p742_p3 = pnand %p741_p2, %p888_p4  ;;  %p748_p7 = scmp.lt.s32.totalorder %s746_s15, %s740_s29 }
  0x80   : > { %v416_v8 = vrot.slane %v409_v7, %v408_v58 }
  0x81   : > { %p743_p5 = pneg %p742_p3  ;;  %p749_p9 = por %p748_p7, %p747_p6 }
  0x82   : > { %422 = vst.msk [vmem:[%s218_s21] sm:$0x3] %vm988_vm10, %v416_v8 }
  0x83   : > { %p750_p10 = pnand %p749_p9, %p743_p5 }
  0x85   : > { %753 = shalt.err (!%p750_p10)
}
  0x86   : > { %s754_s8 = scalar_lea.hbm %s1038_s23, 32  ;;  %s758_s5 = scalar_lea.hbm %s1088_s2, 64 }
  0x87   : > { %p755_p11 = scmp.ne.s32.totalorder %s1038_s23, %s754_s8  ;;  %p759_p0 = scmp.lt.u32.totalorder %s1038_s23, %s1088_s2 }
  0x88   : > { %p760_p1 = scmp.lt.u32.totalorder %s758_s5, %s754_s8  ;;  %p762_p3 = scmp.lt.u32.totalorder %s754_s8, %s1038_s23 }
  0x89   : > { %p756_p12 = pnand %p755_p11, %p888_p4 }
  0x8a   : > { %p761_p2 = por %p760_p1, %p759_p0 }
  0x8b   : > { %p757_p13 = pneg %p756_p12 }
  0x8c   : > { %p763_p5 = por %p762_p3, %p761_p2 }
  0x8e   : > { %p764_p6 = pnand %p763_p5, %p757_p13 }
  0x90   : > { %767 = shalt.err (!%p764_p6)
}
  0x91   : > { %630 = dma.vmem_to_hbm [thread:$0]  (%p888_p4), %s1031_s27, 32, %s1038_s23, %s447_s26  }
  0x92 PF: > { %p641_p7 = scmp.ge.s32.totalorder %s822_s17, 2  ;;  %s496_s10 = sand.u32 1, %s802_s12  }
  0x93   : > { %s497_s19 = scalar_lea.sflag [#allocation3], %s496_s10 }
  0x94   : > { %p635_p9 = pnand %p641_p7, %p895_p8 }
  0x96   : > { %793 = dma.done.wait (!%p635_p9), %s497_s19, 32  }
  0x97   : > { %795 = vsyncadd (!%p635_p9), %s497_s19, 4294967264  ;;  %s506_s21 = scalar_lea.sflag [#allocation5], %s496_s10 }
  0x98   : > { %797 = dma.done.wait (!%p635_p9), %s506_s21, 32  }
  0x99   : > { %799 = vsyncadd (!%p635_p9), %s506_s21, 4294967264  ;;  %s20_s17 = sadd.s32 1, %s822_s17   ;;  %s1096_s12 = smov %s806_s13 }
  0x9a   : > { %p17_p10 = scmp.ge.s32.totalorder %s20_s17, 4   ;;  %s1097_s13 = smov %s810_s14 }
  0x9b   : > { %s1098_s14 = smov %s901_s25  ;;  %s1099_s15 = smov %s818_s16 }
  0x9c   : > { %s1100_s16 = smov %s1102_s20  ;;  %19 = sbr.rel (!%p17_p10) target bundleno = 6 (0x6), region = 83 }
  0xa3   :  { %511 = vsyncpa [#allocation3], 1 }
  0xa4   :  { %513 = vsyncpa [#allocation3 + $0x1], 1 }
  0xa5   :  { %514 = vsyncpa [#allocation5], 1 }
  0xa6   :  { %516 = vsyncpa [#allocation5 + $0x1], 1 }

</bundles_post_ra>
